<compile_context>
chip_gen: v5e
topology: v5e:2x2
jax: 0.10.0
libtpu: 0.0.40
codegen_flags: <defaults>
</compile_context>

<pallas_src>
import functools

import jax
import jax.numpy as jnp
from jax.experimental import pallas as pl
from jax.experimental.pallas import tpu as pltpu

_LANE = 128


def _round_up(a, b):
    return (a + b - 1) // b * b


def _tpu_vmem_bytes():
    """Per-core VMEM capacity, with a conservative (v7x, 64 MiB) fallback."""
    try:
        return int(pltpu.get_tpu_info().vmem_capacity_bytes)
    except Exception:
        return 64 * 1024 * 1024


def _choose_tiling(m_rows, in_size, hp, block_m):
    """Pick the row tile TM and scoped-VMEM limit from the hardware budget."""
    vmem_limit = int(min(_tpu_vmem_bytes() * 3 // 4, 100 * 1024 * 1024))
    # Single-buffered bf16 weights resident in VMEM.
    w_bytes = 2 * (in_size * 3 * hp + hp * 2 * hp + hp * hp)
    # Per-row VMEM cost of one tile:
    #   double-buffered bf16 x / h / out tiles : 2 * (in + 2*Hp) * 2 bytes
    #   f32 intermediates (gx 3Hp, gh 2Hp, zr 2Hp, rh/h'/blend ~3Hp) ~ 10*Hp*4
    per_row = 2 * (in_size + 2 * hp) * 2 + 10 * hp * 4
    budget = max(vmem_limit - w_bytes - (2 << 20), per_row * 8)
    tm = max(8, min(block_m, budget // per_row // 8 * 8))
    # Keep >= 2 grid steps when M allows so dimension_semantics=("parallel",)
    # can actually use both TensorCores on v7x.
    if m_rows > 8:
        tm = min(tm, _round_up(pl.cdiv(m_rows, 2), 8))
    tm = min(tm, _round_up(m_rows, 8))
    return int(tm), vmem_limit


def gru_cell_kernel(x_ref, h_ref, wx_ref, whzr_ref, wih_ref, out_ref):
    """Fused GRU update for one (TM, .) row tile (bf16 I/O, f32 math).

    gx  = x @ [Wzx | Wrx | Wix]             (TM, 3*Hp)
    gh  = h @ [Wzh | Wrh]                   (TM, 2*Hp)
    z|r = sigmoid(gx[:, :2Hp] + gh)
    h'  = tanh(gx[:, 2Hp:] + (r*h) @ Wih)   # r applied BEFORE matmul (spec)
    out = h + z * (h' - h)
    """
    x = x_ref[...]                       # (TM, I)  bf16
    h = h_ref[...]                       # (TM, Hp) bf16
    hp = h.shape[-1]

    # MXU: bf16 inputs, f32 accumulation.
    gx = jnp.dot(x, wx_ref[...], preferred_element_type=jnp.float32)
    gh = jnp.dot(h, whzr_ref[...], preferred_element_type=jnp.float32)

    # One sigmoid over the contiguous z|r slab (VPU/EUP, f32).
    zr = jax.nn.sigmoid(gx[:, :2 * hp] + gh)
    z = zr[:, :hp]
    r = zr[:, hp:]

    hf = h.astype(jnp.float32)
    rh = (r * hf).astype(jnp.bfloat16)
    h_prime = jnp.tanh(
        gx[:, 2 * hp:]
        + jnp.dot(rh, wih_ref[...], preferred_element_type=jnp.float32))

    out_ref[...] = (hf + z * (h_prime - hf)).astype(out_ref.dtype)


def pack_gru_weights(w_update, w_reset, w_input, input_size, hidden_size,
                     lane=_LANE):
    """One-time weight prep (hoisted out of the per-step path).

    Each weight is torch nn.Linear layout (H, I+H). Split into x-part / h-part,
    transpose for row-major matmul, zero-pad hidden width to Hp (multiple of
    128 lanes), fuse gates along the output axis, cast to bf16.
    Returns (wx_all (I, 3*Hp), wh_zr (Hp, 2*Hp), wih (Hp, Hp)).
    """
    in_size, hid = input_size, hidden_size
    hp = _round_up(hid, lane)

    def split(w):
        return w[:, :in_size], w[:, in_size:]          # (H, I), (H, H)

    wzx, wzh = split(w_update)
    wrx, wrh = split(w_reset)
    wix, wih = split(w_input)

    def pad_out(wt):                                   # (K, H) -> (K, Hp)
        return jnp.pad(wt, ((0, 0), (0, hp - hid)))

    def pad_in(wt):                                    # (H, Hp) -> (Hp, Hp)
        return jnp.pad(wt, ((0, hp - hid), (0, 0)))

    wx_all = jnp.concatenate(
        [pad_out(wzx.T), pad_out(wrx.T), pad_out(wix.T)], axis=1)   # (I, 3Hp)
    wh_zr = jnp.concatenate(
        [pad_in(pad_out(wzh.T)), pad_in(pad_out(wrh.T))], axis=1)   # (Hp, 2Hp)
    wih_p = pad_in(pad_out(wih.T))                                  # (Hp, Hp)

    return (wx_all.astype(jnp.bfloat16),
            wh_zr.astype(jnp.bfloat16),
            wih_p.astype(jnp.bfloat16))


def pad_hidden_state(h, lane=_LANE):
    """(B, S, H) -> (B*S, Hp) bf16 with ZERO lane padding. Call once, outside
    the per-step path; gru_cell_step preserves this layout (padded lanes stay
    exactly zero across steps)."""
    b, s, hid = h.shape
    hp = _round_up(hid, lane)
    h2 = h.reshape(b * s, hid).astype(jnp.bfloat16)
    return jnp.pad(h2, ((0, 0), (0, hp - hid)))


def unpad_hidden_state(h_pad, batch, seq, hidden):
    """(M, Hp) bf16 -> (B, S, H). Call once at the end of the recurrence."""
    return h_pad[:, :hidden].reshape(batch, seq, hidden)


@functools.partial(jax.jit, static_argnames=("block_m",), donate_argnums=(1,))
def gru_cell_step(x, h_pad, packed_weights, *, block_m=1024):
    """One GRU step on the persistent padded state.

    x:      (B, S, I) or (M, I), any float dtype.
    h_pad:  (M, Hp) bf16 padded hidden state (donated -> updated in place).
    Returns the new (M, Hp) bf16 hidden state (aliases h_pad's buffer).
    """
    wx_all, wh_zr, wih_p = packed_weights
    hp = wih_p.shape[-1]
    m_rows = h_pad.shape[0]
    in_size = x.shape[-1]
    x2 = x.reshape(m_rows, in_size).astype(jnp.bfloat16)

    tm, vmem_limit = _choose_tiling(m_rows, in_size, hp, block_m)
    grid = (pl.cdiv(m_rows, tm),)

    return pl.pallas_call(
        gru_cell_kernel,
        out_shape=jax.ShapeDtypeStruct((m_rows, hp), jnp.bfloat16),
        grid_spec=pltpu.PrefetchScalarGridSpec(
            num_scalar_prefetch=0,
            grid=grid,
            in_specs=[
                pl.BlockSpec((tm, in_size), lambda i: (i, 0)),   # x tile
                pl.BlockSpec((tm, hp), lambda i: (i, 0)),        # h tile
                # Grid-invariant, VMEM-resident weights: single-buffered.
                pl.BlockSpec((in_size, 3 * hp), lambda i: (0, 0),
                             pipeline_mode=pl.Buffered(1)),
                pl.BlockSpec((hp, 2 * hp), lambda i: (0, 0),
                             pipeline_mode=pl.Buffered(1)),
                pl.BlockSpec((hp, hp), lambda i: (0, 0),
                             pipeline_mode=pl.Buffered(1)),
            ],
            out_specs=pl.BlockSpec((tm, hp), lambda i: (i, 0)),
        ),
        compiler_params=pltpu.CompilerParams(
            dimension_semantics=("parallel",),
            vmem_limit_bytes=vmem_limit,
        ),
        # In-place state update: new hidden state reuses h_pad's HBM buffer.
        input_output_aliases={1: 0},
    )(x2, h_pad, wx_all, wh_zr, wih_p)
    # TODO(synk): if profiling shows exposed per-step DMA at tiny Hp, bump the
    # x/h/out specs to pipeline_mode=pl.Buffered(3) (skip on v7x at large Hp).


def gru_cell(x, h, packed_weights, *, block_m=1024):
    """Drop-in module.forward ((B,S,H) in/out). For recurrent loops prefer
    pad_hidden_state + gru_cell_step + unpad_hidden_state so the pad/slice
    copies happen once instead of every step."""
    b, s, hid = h.shape
    h_new = gru_cell_step(x, pad_hidden_state(h), packed_weights,
                          block_m=block_m)
    return unpad_hidden_state(h_new, b, s, hid).astype(x.dtype)


def xavier_uniform(key, shape):
    # shape = (fan_out, fan_in) as in torch nn.Linear weight
    fan_out, fan_in = shape
    bound = (6.0 / (fan_in + fan_out)) ** 0.5
    return jax.random.uniform(key, shape, jnp.float32, -bound, bound)


def gru_cell_ref(x, h, w_update, w_reset, w_input):
    combined = jnp.concatenate([x, h], axis=2)
    z = jax.nn.sigmoid(combined @ w_update.T)
    r = jax.nn.sigmoid(combined @ w_reset.T)
    h_prime = jnp.tanh(jnp.concatenate([x, r * h], axis=2) @ w_input.T)
    return (1.0 - z) * h + z * h_prime


if __name__ == "__main__":
    B, S, INPUT_SIZE, HIDDEN_SIZE = 2, 8, 16, 32

    key = jax.random.PRNGKey(0)
    k_x, k_h, k_wu, k_wr, k_wi = jax.random.split(key, 5)

    x = jax.random.normal(k_x, (B, S, INPUT_SIZE), jnp.float32)
    h = jax.random.normal(k_h, (B, S, HIDDEN_SIZE), jnp.float32)

    w_shape = (HIDDEN_SIZE, INPUT_SIZE + HIDDEN_SIZE)
    w_update = xavier_uniform(k_wu, w_shape)
    w_reset = xavier_uniform(k_wr, w_shape)
    w_input = xavier_uniform(k_wi, w_shape)

    # One-time weight packing and one-time state padding (outside the
    # per-step path).
    packed = pack_gru_weights(w_update, w_reset, w_input,
                              INPUT_SIZE, HIDDEN_SIZE)
    h_pad = pad_hidden_state(h)

    h_pad_new = gru_cell_step(x, h_pad, packed)
    h_pad_new = jax.block_until_ready(h_pad_new)

    out = unpad_hidden_state(h_pad_new, B, S, HIDDEN_SIZE).astype(jnp.float32)

    ref = gru_cell_ref(x, h, w_update, w_reset, w_input)
    assert out.shape == (B, S, HIDDEN_SIZE)
    # bf16 activations/state + bf16 MXU inputs (f32 accumulation) -> loosened
    # tolerance vs the pure-f32 reference.
    assert jnp.allclose(out, ref, atol=5e-2, rtol=5e-2), (
        float(jnp.max(jnp.abs(out - ref))))

    print("KERNEL_OK")
</pallas_src>

<mosaic_0001>
module attributes {stable_mosaic.version = 11 : i64} {
  func.func @gru_cell_kernel(%arg0: i32, %arg1: memref<8x16xbf16, #tpu.memory_space<vmem>>, %arg2: memref<8x128xbf16, #tpu.memory_space<vmem>>, %arg3: memref<16x384xbf16, #tpu.memory_space<vmem>>, %arg4: memref<128x256xbf16, #tpu.memory_space<vmem>>, %arg5: memref<128x128xbf16, #tpu.memory_space<vmem>>, %arg6: memref<8x128xbf16, #tpu.memory_space<vmem>>) attributes {dimension_semantics = [#tpu.dimension_semantics<parallel>], iteration_bounds = array<i64: 2>, scalar_prefetch = 0 : i64, scratch_operands = 0 : i64, tpu.core_type = #tpu.core_type<tc>, window_params = [{transform_indices = @transform_0, window_bounds = array<i64: 8, 16>}, {transform_indices = @transform_1, window_bounds = array<i64: 8, 128>}, {pipeline_mode = #tpu.pipeline_mode<synchronous>, transform_indices = @transform_2, window_bounds = array<i64: 16, 384>}, {pipeline_mode = #tpu.pipeline_mode<synchronous>, transform_indices = @transform_3, window_bounds = array<i64: 128, 256>}, {pipeline_mode = #tpu.pipeline_mode<synchronous>, transform_indices = @transform_4, window_bounds = array<i64: 128, 128>}, {transform_indices = @transform_5, window_bounds = array<i64: 8, 128>}]} {
    %c0 = arith.constant 0 : index
    %c0_0 = arith.constant 0 : index
    %0 = vector.load %arg1[%c0, %c0_0] : memref<8x16xbf16, #tpu.memory_space<vmem>>, vector<8x16xbf16>
    %c0_1 = arith.constant 0 : index
    %c0_2 = arith.constant 0 : index
    %1 = vector.load %arg2[%c0_1, %c0_2] : memref<8x128xbf16, #tpu.memory_space<vmem>>, vector<8x128xbf16>
    %c0_3 = arith.constant 0 : index
    %c0_4 = arith.constant 0 : index
    %2 = vector.load %arg3[%c0_3, %c0_4] : memref<16x384xbf16, #tpu.memory_space<vmem>>, vector<16x384xbf16>
    %cst = arith.constant dense<0.000000e+00> : vector<8x384xf32>
    %3 = tpu.matmul %0, %2, %cst {dimension_numbers = #tpu.dot_dimension_numbers<[1], [0], [0], [1], [0, 0, 1, 1], [], []>} : vector<8x16xbf16>, vector<16x384xbf16>, vector<8x384xf32> -> vector<8x384xf32>
    %c0_5 = arith.constant 0 : index
    %c0_6 = arith.constant 0 : index
    %4 = vector.load %arg4[%c0_5, %c0_6] : memref<128x256xbf16, #tpu.memory_space<vmem>>, vector<128x256xbf16>
    %cst_7 = arith.constant dense<0.000000e+00> : vector<8x256xf32>
    %5 = tpu.matmul %1, %4, %cst_7 {dimension_numbers = #tpu.dot_dimension_numbers<[1], [0], [0], [1], [0, 0, 1, 1], [], []>} : vector<8x128xbf16>, vector<128x256xbf16>, vector<8x256xf32> -> vector<8x256xf32>
    %6 = vector.extract_strided_slice %3 {offsets = [0, 0], sizes = [8, 256], strides = [1, 1]} : vector<8x384xf32> to vector<8x256xf32>
    %7 = arith.addf %6, %5 : vector<8x256xf32>
    %8 = arith.negf %7 : vector<8x256xf32>
    %9 = math.exp %8 : vector<8x256xf32>
    %cst_8 = arith.constant 1.000000e+00 : f32
    %10 = vector.broadcast %cst_8 : f32 to vector<8x256xf32>
    %11 = arith.addf %10, %9 : vector<8x256xf32>
    %12 = arith.divf %10, %11 : vector<8x256xf32>
    %13 = vector.extract_strided_slice %12 {offsets = [0, 0], sizes = [8, 128], strides = [1, 1]} : vector<8x256xf32> to vector<8x128xf32>
    %14 = vector.extract_strided_slice %12 {offsets = [0, 128], sizes = [8, 128], strides = [1, 1]} : vector<8x256xf32> to vector<8x128xf32>
    %15 = arith.extf %1 : vector<8x128xbf16> to vector<8x128xf32>
    %16 = arith.mulf %14, %15 : vector<8x128xf32>
    %17 = arith.truncf %16 : vector<8x128xf32> to vector<8x128xbf16>
    %18 = vector.extract_strided_slice %3 {offsets = [0, 256], sizes = [8, 128], strides = [1, 1]} : vector<8x384xf32> to vector<8x128xf32>
    %c0_9 = arith.constant 0 : index
    %c0_10 = arith.constant 0 : index
    %19 = vector.load %arg5[%c0_9, %c0_10] : memref<128x128xbf16, #tpu.memory_space<vmem>>, vector<128x128xbf16>
    %cst_11 = arith.constant dense<0.000000e+00> : vector<8x128xf32>
    %20 = tpu.matmul %17, %19, %cst_11 {dimension_numbers = #tpu.dot_dimension_numbers<[1], [0], [0], [1], [0, 0, 1, 1], [], []>} : vector<8x128xbf16>, vector<128x128xbf16>, vector<8x128xf32> -> vector<8x128xf32>
    %21 = arith.addf %18, %20 : vector<8x128xf32>
    %22 = math.tanh %21 : vector<8x128xf32>
    %23 = arith.subf %22, %15 : vector<8x128xf32>
    %24 = arith.mulf %13, %23 : vector<8x128xf32>
    %25 = arith.addf %15, %24 : vector<8x128xf32>
    %26 = arith.truncf %25 : vector<8x128xf32> to vector<8x128xbf16>
    %c0_12 = arith.constant 0 : index
    %c0_13 = arith.constant 0 : index
    %27 = vector.load %arg6[%c0_12, %c0_13] : memref<8x128xbf16, #tpu.memory_space<vmem>>, vector<8x128xbf16>
    tpu.vector_store %arg6[%c0_12, %c0_13], %26 {strides = array<i32>} : memref<8x128xbf16, #tpu.memory_space<vmem>>, vector<8x128xbf16>,
    return
  }
  func.func @transform_0(%arg0: i32) -> (i32, i32) {
    %c0_i32 = arith.constant 0 : i32
    %c0_i32_0 = arith.constant 0 : i32
    return %arg0, %c0_i32 : i32, i32
  }
  func.func @transform_1(%arg0: i32) -> (i32, i32) {
    %c0_i32 = arith.constant 0 : i32
    %c0_i32_0 = arith.constant 0 : i32
    return %arg0, %c0_i32 : i32, i32
  }
  func.func @transform_2(%arg0: i32) -> (i32, i32) {
    %c0_i32 = arith.constant 0 : i32
    %c0_i32_0 = arith.constant 0 : i32
    %c0_i32_1 = arith.constant 0 : i32
    return %c0_i32, %c0_i32_0 : i32, i32
  }
  func.func @transform_3(%arg0: i32) -> (i32, i32) {
    %c0_i32 = arith.constant 0 : i32
    %c0_i32_0 = arith.constant 0 : i32
    %c0_i32_1 = arith.constant 0 : i32
    return %c0_i32, %c0_i32_0 : i32, i32
  }
  func.func @transform_4(%arg0: i32) -> (i32, i32) {
    %c0_i32 = arith.constant 0 : i32
    %c0_i32_0 = arith.constant 0 : i32
    %c0_i32_1 = arith.constant 0 : i32
    return %c0_i32, %c0_i32_0 : i32, i32
  }
  func.func @transform_5(%arg0: i32) -> (i32, i32) {
    %c0_i32 = arith.constant 0 : i32
    %c0_i32_0 = arith.constant 0 : i32
    return %arg0, %c0_i32 : i32, i32
  }
}

</mosaic_0001>

<bundles_post_ra>
// kernel: gru_cell_step.1
= control target key start
LH: loop header
LB: loop body
LE: loop exit
PB: predicated region body
PF: predicated region fallthrough
CT: control target
= control target key end

     0   :  { %10 = vsyncpa [#allocation3], 0  ;;  %s1343_s0 = inlined_call_operand.vmem [shape: bf16[16,16], index: 0, kind: input, shape index: {}]   ;;  %s1344_s1 = inlined_call_operand.hbm [shape: bf16[16,128], index: 1, kind: input, shape index: {}, may-alias: {1,5}]   ;;  %s1345_s2 = inlined_call_operand.vmem [shape: bf16[16,384], index: 2, kind: input, shape index: {}]   ;;  %s1346_s3 = inlined_call_operand.hbm [shape: bf16[128,256], index: 3, kind: input, shape index: {}]   ;;  %s1347_s4 = inlined_call_operand.hbm [shape: bf16[128,128], index: 4, kind: input, shape index: {}]   ;;  %s1348_s5 = inlined_call_operand.hbm [shape: bf16[16,128], index: 5, kind: output, shape index: {}, may-alias: {1,5}]  }
   0x1   :  { %12 = vsyncpa [#allocation3 + $0x1], 0 }
   0x2   :  { %13 = vsyncpa [#allocation6], 0 }
   0x3   :  { %14 = vsyncpa [#allocation4], 0 }
   0x4   :  { %16 = vsyncpa [#allocation4 + $0x1], 0  ;;  %s1160_s18 = smov 0   ;;  %s1162_s19 = smov 0  }
   0x5   :  { %s1164_s20 = smov 0   ;;  %s1166_s21 = smov 0  }
   0x6 LB: > { %s182_s24 = sshll.u32 %s1346_s3, 4  ;;  %s1184_s25 = sadd.s32 4294967295, %s1122_s21   ;;  %s1122_s21 = sphi %s1166_s21, %s1359_s21   ;;  %s1118_s20 = sphi %s1164_s20, %s1358_s20   ;;  %s1114_s19 = sphi %s1162_s19, %s1357_s19   ;;  %s1110_s18 = sphi %s1160_s18, %s1356_s18   ;;  %s183_s24 = int_to_ptr.hbm [resolvable:$true] %s182_s24 }
   0x7   : > { %p725_p0 = scmp.ge.s32.totalorder %s1122_s21, 1  ;;  %p69_p1 = scmp.eq.s32.totalorder %s1184_s25, 0 }
   0x8   : > { %p168_p2 = scmp.lt.s32.totalorder %s1122_s21, 3  ;;  %s1124_s27 = smov [#allocation5]  }
   0x9   : > { %s184_s28 = sshll.u32 %s1124_s27, 4  ;;  %s196_s6 = sshll.u32 %s1347_s4, 4  ;;  %s185_s28 = int_to_ptr.vmem [resolvable:$true] %s184_s28  ;;  %s197_s6 = int_to_ptr.hbm [resolvable:$true] %s196_s6 }
   0xa   : > { %p1189_p3 = pnand %p725_p0, %p168_p2  ;;  %s1125_s7 = smov [#allocation7]  }
   0xb   : > { %s198_s8 = sshll.u32 %s1125_s7, 4  ;;  %s1126_s9 = smov 128   ;;  %s199_s8 = int_to_ptr.vmem [resolvable:$true] %s198_s8 }
   0xc   : > { %p893_p4 = pneg %p1189_p3  ;;  %s1127_s10 = smov 8  }
   0xd   : > { %s1128_s11 = smov 64   ;;  %s1129_s12 = smov 4  }
   0xe   : > { %p894_p6 = pnand %p893_p4, %p69_p1  ;;  %s724_s13 = sadd.s32 4294967294, %s1122_s21  }
   0xf   : > { %s1203_s14 = sadd.s32 1, %s1122_s21   ;;  %s55_s16 = sadd.s32 1, %s1118_s20 }
  0x10   : > { %896 = dma.hbm_to_vmem [thread:$0]  (!%p894_p6), %s183_s24, 2048, %s185_s28, [#allocation6], %s1126_s9, %s1126_s9, %s1127_s10  }
  0x11   : > { %899 = dma.hbm_to_vmem [thread:$0]  (!%p894_p6), %s197_s6, 1024, %s199_s8, [#allocation6], %s1128_s11, %s1128_s11, %s1129_s12  }
  0x12   : > { %s52_s15 = ssub.s32 %s1122_s21, %s1203_s14  ;;  %p62_p8 = scmp.ne.s32.totalorder %s1118_s20, %s1114_s19 }
  0x13   : > { %p53_p7 = scmp.eq.s32.totalorder %s52_s15, 0  ;;  %p63_p9 = scmp.eq.s32.totalorder %s1122_s21, 0 }
  0x14   : > { %p68_p10 = scmp.ne.s32.totalorder %s1114_s19, %s1110_s18  ;;  %p155_p13 = scmp.eq.s32.totalorder %s1184_s25, 1 }
  0x15   : > { %s1214_s17 = scalar_select %p53_p7, %s1118_s20, %s55_s16  }
  0x16   : > { %p1216_p11 = por %p63_p9, %p62_p8  ;;  %p1222_p12 = por %p69_p1, %p68_p10 }
  0x17   : > { %p161_p0 = scmp.eq.s32.totalorder %s724_s13, 1  ;;  %p910_p2 = scmp.lt.s32.totalorder %s1122_s21, 2 }
  0x18   : > { %s219_s24 = sand.u32 1, %s1118_s20   ;;  %p1229_p4 = por %p155_p13, %p62_p8 }
  0x19   : > { %p1233_p6 = por %p161_p0, %p68_p10  ;;  %s729_s29 = sshll.u32 %s219_s24, 2 }
  0x1a   : > { %s730_s30 = sshll.u32 %s1122_s21, 2  ;;  %s223_s9 = scalar_lea.vmem [#allocation2], %s729_s29 }
  0x1b   : > { %s227_s8 = scalar_lea.hbm %s1344_s1, %s730_s30  ;;  %s231_s10 = sshll.u32 %s223_s9, 4  ;;  %s232_s10 = int_to_ptr.vmem [resolvable:$true] %s231_s10 }
  0x1c   : > { %s229_s11 = sshll.u32 %s227_s8, 4  ;;  %p1243_p7 = pnand %p910_p2, %p1216_p11  ;;  %s230_s11 = int_to_ptr.hbm [resolvable:$true] %s229_s11 }
  0x1d   : > { %s220_s13 = scalar_lea.sflag [#allocation3], %s219_s24  ;;  %s1022_s15 = sshra.s32 %s230_s11, 4  ;;  %s1023_s15 = int_to_ptr.hbm [resolvable:$true] %s1022_s15 }
  0x1e   : > { %s1024_s16 = scalar_lea.hbm %s1023_s15, 4  ;;  %p1026_p9 = pneg %p1243_p7 }
  0x1f   : > { %p1025_p8 = scmp.ne.s32.totalorder %s1023_s15, %s1024_s16  ;;  %s1029_s6 = scalar_lea.hbm %s1344_s1, 8 }
  0x20   : > { %p1030_p11 = scmp.lt.s32.totalorder %s1023_s15, %s1344_s1  ;;  %p1031_p0 = scmp.lt.s32.totalorder %s1029_s6, %s1024_s16 }
  0x21   : > { %p1027_p10 = pnand %p1026_p9, %p1025_p8 }
  0x22   : > { %p1032_p2 = por %p1031_p0, %p1030_p11 }
  0x23   : > { %p1028_p13 = pneg %p1027_p10 }
  0x25   : > { %p1033_p5 = pnand %p1032_p2, %p1028_p13 }
  0x27   : > { %1036 = shalt.err (!%p1033_p5)
}
  0x28   : > { %903 = dma.hbm_to_vmem [thread:$0]  (!%p1243_p7), %s230_s11, 64, %s232_s10, %s220_s13  }
  0x29   : > { %240 = sbr.rel (%p1189_p3) target bundleno = 390 (0x186), region = 40  ;;  %s1260_s24 = sand.u32 (!%p1189_p3), 1, %s1114_s19  }
  0x2a   : > { %s732_s8 = sshll.u32 (!%p1189_p3), %s1260_s24, 2  ;;  %s243_s9 = scalar_lea.sflag (!%p1189_p3), [#allocation3], %s1260_s24 }
  0x2b   : > { %s1266_s15 = scalar_lea.vmem (!%p1189_p3), [#allocation2], %s732_s8 }
  0x2e   : > { %1097 = dma.done.wait (%p1222_p12), %s243_s9, 64  }
  0x2f   : > { %1099 = vsyncadd (%p1222_p12), %s243_s9, 4294967232 }
  0x30   : > { %1101 = dma.done.wait (%p69_p1), [#allocation6], 3072  }
  0x31   : > { %1103 = vsyncadd (%p69_p1), [#allocation6], 4294964224  ;;  %p288_p3 = scmp.lt.s32.totalorder %s1184_s25, 1  ;;  %v871_v0 = vld [vmem:[#allocation5 + $0x74] sm:$0xf]  ;;  %vm315_vm0 = vcmask 130048  }
  0x32   : > { %v812_v1 = vld [vmem:[#allocation5 + $0x78] sm:$0xf0]  ;;  %v869_v2 = vld [vmem:[#allocation5 + $0x64] sm:$0xf]  ;;  %v804_v4 = vld [vmem:[#allocation5 + $0x68] sm:$0xf0] }
  0x33   : > { %s289_s26 = scalar_select %p288_p3, %s1184_s25, 1  ;;  %v815_v3 = vor.u32 %v871_v0, %v812_v1  ;;  %v807_v5 = vor.u32 %v869_v2, %v804_v4  ;;  %v854_v6 = vld [vmem:[%s1345_s2 + $0x4] sm:$0xf]  ;;  %v741_v7 = vld [vmem:[%s1345_s2 + $0xc] sm:$0xf0]  ;;  %v879_v57 = vld [vmem:[#allocation7 + $0x30] sm:$0xff] }
  0x34   : > { %v867_v8 = vld [vmem:[#allocation5 + $0x54] sm:$0xf]  ;;  %v796_v9 = vld [vmem:[#allocation5 + $0x58] sm:$0xf0]  ;;  %v744_v10 = vor.u32 %v854_v6, %v741_v7  ;;  %v810_v12 = vld [vmem:[#allocation5 + $0x70] sm:$0xf] }
  0x35   : > { %s736_s10 = sshll.u32 %s289_s26, 2  ;;  %467 = vmatpush.bf16.msra.mxu0 %v815_v3  ;;  %v799_v13 = vor.u32 %v867_v8, %v796_v9  ;;  %v872_v14 = vld [vmem:[#allocation5 + $0x74] sm:$0xf0]  ;;  %v802_v15 = vld [vmem:[#allocation5 + $0x60] sm:$0xf]  ;;  %v878_v59 = vld [vmem:[#allocation7 + $0x28] sm:$0xff] }
  0x36   : > { %s291_s30 = scalar_lea.vmem %s1343_s0, %s736_s10  ;;  %339 = vmatpush.bf16.msra.mxu1 %v744_v10  ;;  %v870_v16 = vld [vmem:[#allocation5 + $0x64] sm:$0xf0]  ;;  %v865_v17 = vld [vmem:[#allocation5 + $0x44] sm:$0xf]  ;;  %v788_v18 = vld [vmem:[#allocation5 + $0x48] sm:$0xf0]  ;;  %v811_v19 = vor.u32 %v872_v14, %v810_v12 }
  0x37   : > { %v1287_v11 = vld [vmem:[%s291_s30] sm:$0xf]  ;;  %v803_v20 = vor.u32 %v870_v16, %v802_v15  ;;  %v791_v21 = vor.u32 %v865_v17, %v788_v18  ;;  %v794_v22 = vld [vmem:[#allocation5 + $0x50] sm:$0xf]  ;;  %v863_v24 = vld [vmem:[#allocation5 + $0x34] sm:$0xf] }
  0x38   : > { %454 = vmatpush.bf16.msra.mxu3 %v811_v19  ;;  %v868_v23 = vld [vmem:[#allocation5 + $0x54] sm:$0xf0]  ;;  %v780_v25 = vld [vmem:[#allocation5 + $0x38] sm:$0xf0]  ;;  %v786_v28 = vld [vmem:[#allocation5 + $0x40] sm:$0xf] }
  0x39   : > { %468 = vmatpush.bf16.msra.mxu0 %v807_v5  ;;  %750 = vmatmul.msk.bf16.vlgmr.msra.gmra.mxu1 %vm315_vm0, %v1287_v11  ;;  %v795_v26 = vor.u32 %v868_v23, %v794_v22  ;;  %v783_v27 = vor.u32 %v863_v24, %v780_v25  ;;  %v866_v29 = vld [vmem:[#allocation5 + $0x44] sm:$0xf0]  ;;  %v861_v30 = vld [vmem:[#allocation5 + $0x24] sm:$0xf]  ;;  %v772_v31 = vld [vmem:[#allocation5 + $0x28] sm:$0xf0] }
  0x3a   : > { %v787_v32 = vor.u32 %v866_v29, %v786_v28  ;;  %v775_v33 = vor.u32 %v861_v30, %v772_v31  ;;  %v778_v34 = vld [vmem:[#allocation5 + $0x30] sm:$0xf]  ;;  %v864_v35 = vld [vmem:[#allocation5 + $0x34] sm:$0xf0]  ;;  %v859_v36 = vld [vmem:[#allocation5 + $0x14] sm:$0xf] }
  0x3b   : > { %v764_v37 = vld [vmem:[#allocation5 + $0x18] sm:$0xf0]  ;;  %v779_v38 = vor.u32 %v864_v35, %v778_v34  ;;  %v770_v40 = vld [vmem:[#allocation5 + $0x20] sm:$0xf]  ;;  %v862_v41 = vld [vmem:[#allocation5 + $0x24] sm:$0xf0] }
  0x3c   : > { %455 = vmatpush.bf16.msra.mxu3 %v803_v20  ;;  %v767_v39 = vor.u32 %v859_v36, %v764_v37  ;;  %v857_v42 = vld [vmem:[#allocation5 + $0x4] sm:$0xf]  ;;  %v756_v43 = vld [vmem:[#allocation5 + $0x8] sm:$0xf0]  ;;  %v771_v44 = vor.u32 %v862_v41, %v770_v40  ;;  %v762_v46 = vld [vmem:[#allocation5 + $0x10] sm:$0xf] }
  0x3d   : > { %469 = vmatpush.bf16.msra.mxu0 %v799_v13  ;;  %v759_v45 = vor.u32 %v857_v42, %v756_v43  ;;  %v860_v47 = vld [vmem:[#allocation5 + $0x14] sm:$0xf0]  ;;  %v855_v51 = vld [vmem:[%s1345_s2 + $0x8] sm:$0xf0]  ;;  %v754_v52 = vld [vmem:[#allocation5] sm:$0xf] }
  0x3e   : > { %v763_v48 = vor.u32 %v860_v47, %v762_v46  ;;  %v294_v49 = vld [vmem:[%s1266_s15] sm:$0xf]  ;;  %v858_v54 = vld [vmem:[#allocation5 + $0x4] sm:$0xf0]  ;;  %v877_v60 = vld [vmem:[#allocation7 + $0x20] sm:$0xff]  ;;  %s851_s11 = sshll.u32 %s1184_s25, 2 }
  0x3f   : > { %v739_v50 = vld [vmem:[%s1345_s2] sm:$0xf]  ;;  %v755_v55 = vor.u32 %v858_v54, %v754_v52  ;;  %v747_v62 = vld [vmem:[%s1345_s2 + $0x8] sm:$0xf]  ;;  %v856_v63 = vld [vmem:[%s1345_s2 + $0x10] sm:$0xf0]  ;;  %v520_v17 = vunpack.c.l.bf16 %v294_v49  ;;  %s618_s16 = scalar_lea.hbm %s1348_s5, %s851_s11 }
  0x40   : > { %456 = vmatpush.bf16.msra.mxu3 %v795_v26  ;;  %v740_v53 = vor.u32 %v855_v51, %v739_v50  ;;  %v880_v56 = vld [vmem:[#allocation7 + $0x38] sm:$0xff]  ;;  %v748_v0 = vor.u32 %v856_v63, %v747_v62  ;;  %v875_v2 = vld [vmem:[#allocation7 + $0x10] sm:$0xff]  ;;  %v874_v3 = vld [vmem:[#allocation7 + $0x8] sm:$0xff]  ;;  %s287_s29 = scalar_lea.vmem [#allocation8], %s732_s8  ;;  %s622_s6 = sshll.u32 %s618_s16, 4  ;;  %s623_s6 = int_to_ptr.hbm [resolvable:$true] %s622_s6 }
  0x41   : > { %470 = vmatpush.bf16.msra.mxu0 %v791_v21  ;;  %587 = vmatpush.bf16.msrb.mxu1 %v880_v56  ;;  %v876_v1 = vld [vmem:[#allocation7 + $0x18] sm:$0xff]  ;;  %v873_v4 = vld [vmem:[#allocation7] sm:$0xff]  ;;  %s620_s30 = sshll.u32 %s287_s29, 4  ;;  %s608_s25 = scalar_lea.sflag [#allocation4], %s1260_s24  ;;  %s621_s30 = int_to_ptr.vmem [resolvable:$true] %s620_s30 }
  0x42   : > { %326 = vmatpush.bf16.msra.mxu2 %v740_v53  ;;  %s1066_s7 = sshra.s32 %s623_s6, 4  ;;  %s1072_s26 = scalar_lea.hbm %s1348_s5, 8  ;;  %s1067_s7 = int_to_ptr.hbm [resolvable:$true] %s1066_s7 }
  0x43   : > { %s1068_s22 = scalar_lea.hbm %s1067_s7, 4  ;;  %p1073_p7 = scmp.lt.s32.totalorder %s1067_s7, %s1348_s5 }
  0x44   : > { %457 = vmatpush.bf16.msra.mxu3 %v787_v32  ;;  %p1069_p1 = scmp.ne.s32.totalorder %s1067_s7, %s1068_s22  ;;  %p1074_p8 = scmp.lt.s32.totalorder %s1072_s26, %s1068_s22 }
  0x45   : > { %471 = vmatpush.bf16.msra.mxu0 %v783_v27  ;;  %749 = vmatmul.msk.bf16.vlgmr.msra.gmra.mxu2 %vm315_vm0, %v1287_v11 }
  0x46   : > { %588 = vmatpush.bf16.msrb.mxu1 %v879_v57  ;;  %352 = vmatpush.bf16.msrb.mxu2 %v748_v0  ;;  %p1070_p5 = pnand %p1069_p1, %p1229_p4  ;;  %p1075_p9 = por %p1074_p8, %p1073_p7 }
  0x48   : > { %458 = vmatpush.bf16.msra.mxu3 %v779_v38  ;;  %p1071_p12 = pneg %p1070_p5 }
  0x49   : > { %472 = vmatpush.bf16.msra.mxu0 %v775_v33 }
  0x4a   : > { %589 = vmatpush.bf16.msrb.mxu1 %v878_v59  ;;  %p1076_p10 = pnand %p1075_p9, %p1071_p12 }
  0x4c   : > { %459 = vmatpush.bf16.msra.mxu3 %v771_v44 }
  0x4d   : > { %473 = vmatpush.bf16.msra.mxu0 %v767_v39 }
  0x4e   : > { %590 = vmatpush.bf16.msrb.mxu1 %v877_v60 }
  0x50   : > { %460 = vmatpush.bf16.msra.mxu3 %v763_v48 }
  0x51   : > { %474 = vmatpush.bf16.msra.mxu0 %v759_v45 }
  0x52   : > { %591 = vmatpush.bf16.msrb.mxu1 %v876_v1 }
  0x54   : > { %475 = vmatmul.bf16.vlgmr.msra.gmra.mxu0 %v294_v49  ;;  %461 = vmatpush.bf16.msra.mxu3 %v755_v55 }
  0x55   : > { %751 = vmatmul.msk.bf16.vlgmr.msrb.gmra.mxu2 %vm315_vm0, %v1287_v11 }
  0x56   : > { %592 = vmatpush.bf16.msrb.mxu1 %v875_v2 }
  0x57   : > { %462 = vmatmul.bf16.vlgmr.msra.gmra.mxu3 %v294_v49 }
  0x5a   : > { %593 = vmatpush.bf16.msrb.mxu1 %v874_v3 }
  0x5e   : > { %594 = vmatpush.bf16.msrb.mxu1 %v873_v4 }
  0xb6   : > { %v341_v58 = vpop.f32.mrf.mxu1 }
  0xbe   : > { %v343_v61 = vpop.f32.mrf.mxu1 }
  0xc8   : > { %v328_v24 = vpop.f32.mrf.mxu2 }
  0xd0   : > { %v330_v26 = vpop.f32.mrf.mxu2 }
  0xd1   : > { %v476_v5 = vpop.f32.mrf.mxu0 }
  0xd2   : > { %v481_v6 = vadd.f32 %v476_v5, %v341_v58 }
  0xd4   : > { %v817_v7 = vmul.f32 -1.442695, %v481_v6 }
  0xd6   : > { %952 = vpow2.f32 %v817_v7 }
  0xd8   : > { %v354_v28 = vpop.f32.mrf.mxu2 }
  0xd9   : > { %v478_v8 = vpop.f32.mrf.mxu0 }
  0xda   : > { %v463_v25 = vpop.f32.mrf.mxu3 }
  0xdb   : > { %v480_v29 = vadd.f32 %v463_v25, %v328_v24 }
  0xdc   : > { %v953_v9 = vpop.eup %952 }
  0xdd   : > { %v489_v10 = vadd.f32 1.0, %v953_v9  ;;  %v816_v30 = vmul.f32 -1.442695, %v480_v29 }
  0xdf   : > { %954 = vrcp.f32 %v489_v10  ;;  %v516_v15 = vand.u32 2147483648, %v489_v10  ;;  %v514_v11 = vand.u32 2147483647, %v489_v10  ;;  %vm510_vm2 = vweird.f32 %v489_v10 }
  0xe0   : > { %v356_v31 = vpop.f32.mrf.mxu2  ;;  %956 = vpow2.f32 %v816_v30 }
  0xe1   : > { %v517_v19 = vor.u32 1.1754944e-38, %v516_v15  ;;  %vm515_vm4 = vcmp.eq.f32.partialorder %v514_v11, 8.507059e+37 }
  0xe2   : > { %v465_v27 = vpop.f32.mrf.mxu3 }
  0xe5   : > { %v955_v12 = vpop.eup %954 }
  0xe6   : > { %v506_v13 = vmul.f32 %v955_v12, %v489_v10  ;;  %vm511_vm1 = vweird.f32 %v955_v12  ;;  %v957_v32 = vpop.eup %956 }
  0xe7   : > { %vm512_vm3 = vmor %vm510_vm2, %vm511_vm1  ;;  %v488_v33 = vadd.f32 1.0, %v957_v32 }
  0xe8   : > { %v507_v14 = vsub.f32 1.0, %v506_v13 }
  0xe9   : > { %958 = vrcp.f32 %v488_v33  ;;  %vm495_vm5 = vweird.f32 %v488_v33  ;;  %v501_v40 = vand.u32 2147483648, %v488_v33  ;;  %v499_v42 = vand.u32 2147483647, %v488_v33 }
  0xea   : > { %v508_v16 = vmul.f32 %v955_v12, %v507_v14 }
  0xeb   : > { %v502_v43 = vor.u32 1.1754944e-38, %v501_v40  ;;  %vm500_vm8 = vcmp.eq.f32.partialorder %v499_v42, 8.507059e+37 }
  0xec   : > { %v509_v18 = vadd.f32 %v955_v12, %v508_v16 }
  0xee   : > { %v513_v20 = vsel %vm512_vm3, %v955_v12, %v509_v18 }
  0xef   : > { %v518_v21 = vsel %vm515_vm4, %v517_v19, %v513_v20  ;;  %v959_v34 = vpop.eup %958 }
  0xf0   : > { %v521_v22 = vmul.f32 %v520_v17, %v518_v21  ;;  %v491_v35 = vmul.f32 %v959_v34, %v488_v33  ;;  %vm496_vm6 = vweird.f32 %v959_v34 }
  0xf1   : > { %vm497_vm7 = vmor %vm495_vm5, %vm496_vm6 }
  0xf2   : > { %v522_v23 = vpack.c.bf16 %v521_v22, %v521_v22  ;;  %v492_v36 = vsub.f32 1.0, %v491_v35 }
  0xf4   : > { %595 = vmatmul.bf16.vlgmr.msrb.gmra.mxu1 %v522_v23  ;;  %v493_v37 = vmul.f32 %v959_v34, %v492_v36 }
  0xf6   : > { %v494_v41 = vadd.f32 %v959_v34, %v493_v37 }
  0xf8   : > { %v498_v44 = vsel %vm497_vm7, %v959_v34, %v494_v41 }
  0xf9   : > { %v503_v48 = vsel %vm500_vm8, %v502_v43, %v498_v44 }
 0x171   : > { %v596_v38 = vpop.f32.mrf.mxu1 }
 0x172   : > { %v600_v39 = vadd.f32 %v596_v38, %v354_v28 }
 0x174   : > { %960 = vtanh.f32 %v600_v39 }
 0x179   : > { %v598_v45 = vpop.f32.mrf.mxu1 }
 0x17a   : > { %v961_v46 = vpop.eup %960 }
 0x17b   : > { %v602_v47 = vsub.f32 %v961_v46, %v520_v17 }
 0x17d   : > { %v603_v49 = vmul.f32 %v602_v47, %v503_v48 }
 0x17f   : > { %v604_v50 = vadd.f32 %v603_v49, %v520_v17 }
 0x181   : > { %v605_v51 = vpack.c.bf16 %v604_v50, %v604_v50 }
 0x183   : > { %606 = vst [vmem:[%s287_s29] sm:$0xf] %v605_v51 }
 0x184   : > { %1079 = shalt.err (!%p1076_p10)
}
 0x185   : > { %891 = dma.vmem_to_hbm [thread:$0]  (%p1229_p4), %s621_s30, 64, %s623_s6, %s608_s25  }
 0x186 PF: > { %s634_s24 = sand.u32 1, %s1110_s18   ;;  %p1355_p13 = scmp.ge.s32.totalorder %s1122_s21, 2 }
 0x187   : > { %s635_s23 = scalar_lea.sflag [#allocation4], %s634_s24 }
 0x188   : > { %p905_p11 = pnand %p1355_p13, %p1233_p6 }
 0x18a   : > { %p906_p0 = pneg %p905_p11 }
 0x18c   : > { %1105 = dma.done.wait (%p906_p0), %s635_s23, 64  }
 0x18d   : > { %1107 = vsyncadd (%p906_p0), %s635_s23, 4294967232  ;;  %p19_p2 = scmp.ge.s32.totalorder %s1203_s14, 4   ;;  %s1356_s18 = smov %s1114_s19 }
 0x18e   : > { %s1357_s19 = smov %s1118_s20  ;;  %s1358_s20 = smov %s1214_s17 }
 0x18f   : > { %s1359_s21 = smov %s1203_s14  ;;  %21 = sbr.rel (!%p19_p2) target bundleno = 6 (0x6), region = 96 }
 0x194   :  { %641 = vsyncpa [#allocation3], 1 }
 0x195   :  { %643 = vsyncpa [#allocation3 + $0x1], 1 }
 0x196   :  { %644 = vsyncpa [#allocation6], 1 }
 0x197   :  { %645 = vsyncpa [#allocation4], 1 }
 0x198   :  { %647 = vsyncpa [#allocation4 + $0x1], 1 }

</bundles_post_ra>
